<compile_context>
chip_gen: v7x
topology: tpu7x:2x2x1
jax: 0.10.0
libtpu: 0.0.40
codegen_flags: <defaults>
</compile_context>

<pallas_src>
import numpy as np
import jax
import jax.numpy as jnp
from jax.experimental import pallas as pl
from jax.experimental.pallas import tpu as pltpu


def _softplus(v):
    # Numerically stable softplus matching F.softplus semantics.
    return jnp.maximum(v, 0.0) + jnp.log1p(jnp.exp(-jnp.abs(v)))


def policy_kernel(obs_ref, eps_ref, w1_ref, b1_ref, w2_ref, b2_ref,
                  wh_ref, bh_ref, max_ref, act_ref, lp_ref):
    out_dims = eps_ref.shape[-1]

    # net: Linear -> ReLU -> Linear -> ReLU
    # (bf16 MXU inputs, f32 accumulate, bias-add / ReLU in f32)
    h1 = jnp.dot(obs_ref[...], w1_ref[...],
                 preferred_element_type=jnp.float32) + b1_ref[...]
    h1 = jnp.maximum(h1, 0.0)
    h2 = jnp.dot(h1.astype(w2_ref.dtype), w2_ref[...],
                 preferred_element_type=jnp.float32) + b2_ref[...]
    h2 = jnp.maximum(h2, 0.0)

    # fused mu / std heads: one matmul, then static lane slices
    heads = jnp.dot(h2.astype(wh_ref.dtype), wh_ref[...],
                    preferred_element_type=jnp.float32) + bh_ref[...]
    mu = heads[:, :out_dims]
    std = _softplus(heads[:, out_dims:]) + 0.001

    # reparameterized sample (Normal.rsample): action = mu + std * eps
    eps = eps_ref[...]
    action = mu + std * eps

    # Normal.log_prob(action): since (action - mu) == std * eps exactly,
    # -((action-mu)^2)/(2*std^2) == -0.5*eps^2  (no divide needed).
    lp = -0.5 * eps * eps - jnp.log(std) - 0.5 * jnp.log(2.0 * jnp.pi)
    # tanh-squash correction: 2*(log(2) - a - softplus(-2a))
    corr = 2.0 * (jnp.log(2.0) - action - _softplus(-2.0 * action))
    # single cross-lane (XLU) reduction for both terms
    lp_ref[...] = jnp.sum(lp - corr, axis=-1, keepdims=True)

    act_ref[...] = jnp.tanh(action) * max_ref[...]


def prepare_policy_params(params, max_vec, compute_dtype=jnp.bfloat16):
    """One-time param prep (hoisted out of the per-step forward path):
    transpose weights to [in, out], fuse the mu/std heads, cast to bf16,
    lift biases / max to [1, N] f32 for 2-D broadcasting."""
    wheads = jnp.concatenate([params["wmu"].T, params["wstd"].T], axis=1)
    bheads = jnp.concatenate([params["bmu"], params["bstd"]], axis=0)
    return {
        "w1t": params["w1"].T.astype(compute_dtype),
        "b1": params["b1"].reshape(1, -1).astype(jnp.float32),
        "w2t": params["w2"].T.astype(compute_dtype),
        "b2": params["b2"].reshape(1, -1).astype(jnp.float32),
        "wheads": wheads.astype(compute_dtype),
        "bheads": bheads.reshape(1, -1).astype(jnp.float32),
        "max2d": max_vec.reshape(1, -1).astype(jnp.float32),
    }


def gradient_policy_forward(obs, packed, eps, *, block_b=512):
    """Pallas equivalent of GradientPolicy.forward.

    obs:    [B, obs_size] (any float dtype; cast to bf16 for the MXU)
    packed: output of prepare_policy_params
    eps:    [B, out_dims] standard-normal noise (the rsample noise)
    returns (action [B, out_dims], log_prob [B, 1]) in f32
    """
    B, obs_size = obs.shape
    out_dims = eps.shape[-1]

    # Batch tile: whole batch if small, otherwise block_b rows per grid step.
    # block_b=512 keeps double-buffered input tiles + resident weights +
    # [TB, hidden] f32 temporaries far under the scoped-VMEM default on
    # v5e/v6e/v7x at SAC-scale hidden sizes.
    TB = B if B <= block_b else block_b
    grid = (pl.cdiv(B, TB),)

    compute_dtype = packed["w1t"].dtype
    obs_c = obs.astype(compute_dtype)
    eps_c = eps.astype(jnp.float32)

    def row_spec(last):
        return pl.BlockSpec((TB, last), lambda i: (i, 0))

    def resident_spec(arr):
        # Same block index every grid step => stays VMEM-resident, no re-DMA.
        return pl.BlockSpec(arr.shape, lambda i: (0, 0))

    action, log_prob = pl.pallas_call(
        policy_kernel,
        out_shape=(
            jax.ShapeDtypeStruct((B, out_dims), jnp.float32),
            jax.ShapeDtypeStruct((B, 1), jnp.float32),
        ),
        grid=grid,
        in_specs=[
            row_spec(obs_size),                 # obs tile
            row_spec(out_dims),                 # eps tile
            resident_spec(packed["w1t"]),
            resident_spec(packed["b1"]),
            resident_spec(packed["w2t"]),
            resident_spec(packed["b2"]),
            resident_spec(packed["wheads"]),
            resident_spec(packed["bheads"]),
            resident_spec(packed["max2d"]),
        ],
        out_specs=(
            row_spec(out_dims),                 # squashed action tile
            row_spec(1),                        # log_prob tile
        ),
        compiler_params=pltpu.CompilerParams(
            dimension_semantics=("parallel",),  # shards batch tiles on v7x's 2 TCs
        ),
    )(obs_c, eps_c, packed["w1t"], packed["b1"], packed["w2t"], packed["b2"],
      packed["wheads"], packed["bheads"], packed["max2d"])

    return action, log_prob


def make_params(key, obs_size, hidden_size, out_dims):
    ks = jax.random.split(key, 8)

    def lin(kw, kb, fan_in, fan_out):
        bound = 1.0 / np.sqrt(fan_in)
        w = jax.random.uniform(kw, (fan_out, fan_in), jnp.float32, -bound, bound)
        b = jax.random.uniform(kb, (fan_out,), jnp.float32, -bound, bound)
        return w, b

    w1, b1 = lin(ks[0], ks[1], obs_size, hidden_size)
    w2, b2 = lin(ks[2], ks[3], hidden_size, hidden_size)
    wmu, bmu = lin(ks[4], ks[5], hidden_size, out_dims)
    wstd, bstd = lin(ks[6], ks[7], hidden_size, out_dims)
    return {"w1": w1, "b1": b1, "w2": w2, "b2": b2,
            "wmu": wmu, "bmu": bmu, "wstd": wstd, "bstd": bstd}


def reference_forward(obs, params, max_vec, eps):
    """Pure-JAX f32 reference matching the PyTorch module."""
    h1 = jnp.maximum(obs @ params["w1"].T + params["b1"], 0.0)
    h2 = jnp.maximum(h1 @ params["w2"].T + params["b2"], 0.0)
    mu = h2 @ params["wmu"].T + params["bmu"]
    std = _softplus(h2 @ params["wstd"].T + params["bstd"]) + 0.001
    action = mu + std * eps
    lp = (-((action - mu) ** 2) / (2.0 * std * std)
          - jnp.log(std) - 0.5 * jnp.log(2.0 * jnp.pi))
    lp_sum = jnp.sum(lp, axis=-1, keepdims=True)
    corr = 2.0 * (jnp.log(2.0) - action - _softplus(-2.0 * action))
    lp_sum = lp_sum - jnp.sum(corr, axis=-1, keepdims=True)
    return jnp.tanh(action) * max_vec, lp_sum


if __name__ == "__main__":
    batch, obs_size, hidden_size, out_dims = 8, 32, 64, 8

    key = jax.random.PRNGKey(0)
    k_params, k_obs, k_eps, k_max = jax.random.split(key, 4)

    params = make_params(k_params, obs_size, hidden_size, out_dims)
    obs = jax.random.normal(k_obs, (batch, obs_size), jnp.float32)
    # TODO(synk): the noise draw of Normal.rsample() is done here in plain JAX
    # (deterministic key) and fed to the kernel as eps.
    eps = jax.random.normal(k_eps, (batch, out_dims), jnp.float32)
    # action-space "high" vector (the `max` numpy array in the module)
    max_vec = jax.random.uniform(k_max, (out_dims,), jnp.float32, 0.5, 2.0)

    packed = prepare_policy_params(params, max_vec)
    action, log_prob = gradient_policy_forward(obs, packed, eps)
    jax.block_until_ready((action, log_prob))

    assert action.shape == (batch, out_dims)
    assert log_prob.shape == (batch, 1)
    assert bool(jnp.all(jnp.isfinite(action))) and bool(jnp.all(jnp.isfinite(log_prob)))

    # Loose check vs the f32 reference (bf16 matmul inputs -> small drift).
    a_ref, lp_ref = reference_forward(obs, params, max_vec, eps)
    assert bool(jnp.allclose(action, a_ref, rtol=0.1, atol=0.15))
    assert bool(jnp.allclose(log_prob, lp_ref, rtol=0.1, atol=0.2))

    print("KERNEL_OK")
</pallas_src>

<mosaic_0001>
module attributes {stable_mosaic.version = 11 : i64} {
  func.func @policy_kernel(%arg0: i32, %arg1: memref<8x32xbf16, #tpu.memory_space<vmem>>, %arg2: memref<8x8xf32, #tpu.memory_space<vmem>>, %arg3: memref<32x64xbf16, #tpu.memory_space<vmem>>, %arg4: memref<1x64xf32, #tpu.memory_space<vmem>>, %arg5: memref<64x64xbf16, #tpu.memory_space<vmem>>, %arg6: memref<1x64xf32, #tpu.memory_space<vmem>>, %arg7: memref<64x16xbf16, #tpu.memory_space<vmem>>, %arg8: memref<1x16xf32, #tpu.memory_space<vmem>>, %arg9: memref<1x8xf32, #tpu.memory_space<vmem>>, %arg10: memref<8x8xf32, #tpu.memory_space<vmem>>, %arg11: memref<8x1xf32, #tpu.memory_space<vmem>>) attributes {dimension_semantics = [#tpu.dimension_semantics<parallel>], iteration_bounds = array<i64: 1>, scalar_prefetch = 0 : i64, scratch_operands = 0 : i64, tpu.core_type = #tpu.core_type<tc>, window_params = [{transform_indices = @transform_0, window_bounds = array<i64: 8, 32>}, {transform_indices = @transform_1, window_bounds = array<i64: 8, 8>}, {pipeline_mode = #tpu.pipeline_mode<synchronous>, transform_indices = @transform_2, window_bounds = array<i64: 32, 64>}, {pipeline_mode = #tpu.pipeline_mode<synchronous>, transform_indices = @transform_3, window_bounds = array<i64: 1, 64>}, {pipeline_mode = #tpu.pipeline_mode<synchronous>, transform_indices = @transform_4, window_bounds = array<i64: 64, 64>}, {pipeline_mode = #tpu.pipeline_mode<synchronous>, transform_indices = @transform_5, window_bounds = array<i64: 1, 64>}, {pipeline_mode = #tpu.pipeline_mode<synchronous>, transform_indices = @transform_6, window_bounds = array<i64: 64, 16>}, {pipeline_mode = #tpu.pipeline_mode<synchronous>, transform_indices = @transform_7, window_bounds = array<i64: 1, 16>}, {pipeline_mode = #tpu.pipeline_mode<synchronous>, transform_indices = @transform_8, window_bounds = array<i64: 1, 8>}, {transform_indices = @transform_9, window_bounds = array<i64: 8, 8>}, {transform_indices = @transform_10, window_bounds = array<i64: 8, 1>}]} {
    %c0 = arith.constant 0 : index
    %c0_0 = arith.constant 0 : index
    %0 = vector.load %arg1[%c0, %c0_0] : memref<8x32xbf16, #tpu.memory_space<vmem>>, vector<8x32xbf16>
    %c0_1 = arith.constant 0 : index
    %c0_2 = arith.constant 0 : index
    %1 = vector.load %arg3[%c0_1, %c0_2] : memref<32x64xbf16, #tpu.memory_space<vmem>>, vector<32x64xbf16>
    %cst = arith.constant dense<0.000000e+00> : vector<8x64xf32>
    %2 = tpu.matmul %0, %1, %cst {dimension_numbers = #tpu.dot_dimension_numbers<[1], [0], [0], [1], [0, 0, 1, 1], [], []>} : vector<8x32xbf16>, vector<32x64xbf16>, vector<8x64xf32> -> vector<8x64xf32>
    %c0_3 = arith.constant 0 : index
    %c0_4 = arith.constant 0 : index
    %3 = vector.load %arg4[%c0_3, %c0_4] : memref<1x64xf32, #tpu.memory_space<vmem>>, vector<1x64xf32>
    %4 = vector.broadcast %3 : vector<1x64xf32> to vector<8x64xf32>
    %5 = arith.addf %2, %4 : vector<8x64xf32>
    %cst_5 = arith.constant 0.000000e+00 : f32
    %6 = vector.broadcast %cst_5 : f32 to vector<8x64xf32>
    %7 = arith.maximumf %5, %6 : vector<8x64xf32>
    %8 = arith.truncf %7 : vector<8x64xf32> to vector<8x64xbf16>
    %c0_6 = arith.constant 0 : index
    %c0_7 = arith.constant 0 : index
    %9 = vector.load %arg5[%c0_6, %c0_7] : memref<64x64xbf16, #tpu.memory_space<vmem>>, vector<64x64xbf16>
    %cst_8 = arith.constant dense<0.000000e+00> : vector<8x64xf32>
    %10 = tpu.matmul %8, %9, %cst_8 {dimension_numbers = #tpu.dot_dimension_numbers<[1], [0], [0], [1], [0, 0, 1, 1], [], []>} : vector<8x64xbf16>, vector<64x64xbf16>, vector<8x64xf32> -> vector<8x64xf32>
    %c0_9 = arith.constant 0 : index
    %c0_10 = arith.constant 0 : index
    %11 = vector.load %arg6[%c0_9, %c0_10] : memref<1x64xf32, #tpu.memory_space<vmem>>, vector<1x64xf32>
    %12 = vector.broadcast %11 : vector<1x64xf32> to vector<8x64xf32>
    %13 = arith.addf %10, %12 : vector<8x64xf32>
    %cst_11 = arith.constant 0.000000e+00 : f32
    %14 = vector.broadcast %cst_11 : f32 to vector<8x64xf32>
    %15 = arith.maximumf %13, %14 : vector<8x64xf32>
    %16 = arith.truncf %15 : vector<8x64xf32> to vector<8x64xbf16>
    %c0_12 = arith.constant 0 : index
    %c0_13 = arith.constant 0 : index
    %17 = vector.load %arg7[%c0_12, %c0_13] : memref<64x16xbf16, #tpu.memory_space<vmem>>, vector<64x16xbf16>
    %cst_14 = arith.constant dense<0.000000e+00> : vector<8x16xf32>
    %18 = tpu.matmul %16, %17, %cst_14 {dimension_numbers = #tpu.dot_dimension_numbers<[1], [0], [0], [1], [0, 0, 1, 1], [], []>} : vector<8x64xbf16>, vector<64x16xbf16>, vector<8x16xf32> -> vector<8x16xf32>
    %c0_15 = arith.constant 0 : index
    %c0_16 = arith.constant 0 : index
    %19 = vector.load %arg8[%c0_15, %c0_16] : memref<1x16xf32, #tpu.memory_space<vmem>>, vector<1x16xf32>
    %20 = vector.broadcast %19 : vector<1x16xf32> to vector<8x16xf32>
    %21 = arith.addf %18, %20 : vector<8x16xf32>
    %22 = vector.extract_strided_slice %21 {offsets = [0, 0], sizes = [8, 8], strides = [1, 1]} : vector<8x16xf32> to vector<8x8xf32>
    %23 = vector.extract_strided_slice %21 {offsets = [0, 8], sizes = [8, 8], strides = [1, 1]} : vector<8x16xf32> to vector<8x8xf32>
    %cst_17 = arith.constant 0.000000e+00 : f32
    %24 = vector.broadcast %cst_17 : f32 to vector<8x8xf32>
    %25 = arith.maximumf %23, %24 : vector<8x8xf32>
    %26 = math.absf %23 : vector<8x8xf32>
    %cst_18 = arith.constant 0.000000e+00 : f32
    %27 = vector.broadcast %cst_18 : f32 to vector<8x8xf32>
    %28 = arith.subf %27, %26 : vector<8x8xf32>
    %29 = math.exp %28 : vector<8x8xf32>
    %30 = math.log1p %29 : vector<8x8xf32>
    %31 = arith.addf %25, %30 : vector<8x8xf32>
    %cst_19 = arith.constant 1.000000e-03 : f32
    %32 = vector.broadcast %cst_19 : f32 to vector<8x8xf32>
    %33 = arith.addf %31, %32 : vector<8x8xf32>
    %c0_20 = arith.constant 0 : index
    %c0_21 = arith.constant 0 : index
    %34 = vector.load %arg2[%c0_20, %c0_21] : memref<8x8xf32, #tpu.memory_space<vmem>>, vector<8x8xf32>
    %35 = arith.mulf %33, %34 : vector<8x8xf32>
    %36 = arith.addf %22, %35 : vector<8x8xf32>
    %cst_22 = arith.constant -5.000000e-01 : f32
    %37 = vector.broadcast %cst_22 : f32 to vector<8x8xf32>
    %38 = arith.mulf %37, %34 : vector<8x8xf32>
    %39 = arith.mulf %38, %34 : vector<8x8xf32>
    %40 = math.log %33 : vector<8x8xf32>
    %41 = arith.subf %39, %40 : vector<8x8xf32>
    %cst_23 = arith.constant 6.28318548 : f32
    %42 = math.log %cst_23 : f32
    %cst_24 = arith.constant 5.000000e-01 : f32
    %43 = arith.mulf %cst_24, %42 : f32
    %44 = vector.broadcast %43 : f32 to vector<8x8xf32>
    %45 = arith.subf %41, %44 : vector<8x8xf32>
    %cst_25 = arith.constant 2.000000e+00 : f32
    %46 = math.log %cst_25 : f32
    %47 = vector.broadcast %46 : f32 to vector<8x8xf32>
    %48 = arith.subf %47, %36 : vector<8x8xf32>
    %cst_26 = arith.constant -2.000000e+00 : f32
    %49 = vector.broadcast %cst_26 : f32 to vector<8x8xf32>
    %50 = arith.mulf %49, %36 : vector<8x8xf32>
    %cst_27 = arith.constant 0.000000e+00 : f32
    %51 = vector.broadcast %cst_27 : f32 to vector<8x8xf32>
    %52 = arith.maximumf %50, %51 : vector<8x8xf32>
    %53 = math.absf %50 : vector<8x8xf32>
    %cst_28 = arith.constant 0.000000e+00 : f32
    %54 = vector.broadcast %cst_28 : f32 to vector<8x8xf32>
    %55 = arith.subf %54, %53 : vector<8x8xf32>
    %56 = math.exp %55 : vector<8x8xf32>
    %57 = math.log1p %56 : vector<8x8xf32>
    %58 = arith.addf %52, %57 : vector<8x8xf32>
    %59 = arith.subf %48, %58 : vector<8x8xf32>
    %cst_29 = arith.constant 2.000000e+00 : f32
    %60 = vector.broadcast %cst_29 : f32 to vector<8x8xf32>
    %61 = arith.mulf %60, %59 : vector<8x8xf32>
    %62 = arith.subf %45, %61 : vector<8x8xf32>
    %cst_30 = arith.constant dense<0.000000e+00> : vector<8xf32>
    %63 = vector.multi_reduction <add>, %62, %cst_30 [1] : vector<8x8xf32> to vector<8xf32>
    %64 = vector.shape_cast %63 : vector<8xf32> to vector<8x1xf32>
    %c0_31 = arith.constant 0 : index
    %c0_32 = arith.constant 0 : index
    %65 = vector.load %arg11[%c0_31, %c0_32] : memref<8x1xf32, #tpu.memory_space<vmem>>, vector<8x1xf32>
    tpu.vector_store %arg11[%c0_31, %c0_32], %64 {strides = array<i32>} : memref<8x1xf32, #tpu.memory_space<vmem>>, vector<8x1xf32>,
    %66 = math.tanh %36 : vector<8x8xf32>
    %c0_33 = arith.constant 0 : index
    %c0_34 = arith.constant 0 : index
    %67 = vector.load %arg9[%c0_33, %c0_34] : memref<1x8xf32, #tpu.memory_space<vmem>>, vector<1x8xf32>
    %68 = vector.broadcast %67 : vector<1x8xf32> to vector<8x8xf32>
    %69 = arith.mulf %66, %68 : vector<8x8xf32>
    %c0_35 = arith.constant 0 : index
    %c0_36 = arith.constant 0 : index
    %70 = vector.load %arg10[%c0_35, %c0_36] : memref<8x8xf32, #tpu.memory_space<vmem>>, vector<8x8xf32>
    tpu.vector_store %arg10[%c0_35, %c0_36], %69 {strides = array<i32>} : memref<8x8xf32, #tpu.memory_space<vmem>>, vector<8x8xf32>,
    return
  }
  func.func @transform_0(%arg0: i32) -> (i32, i32) {
    %c0_i32 = arith.constant 0 : i32
    %c0_i32_0 = arith.constant 0 : i32
    return %arg0, %c0_i32 : i32, i32
  }
  func.func @transform_1(%arg0: i32) -> (i32, i32) {
    %c0_i32 = arith.constant 0 : i32
    %c0_i32_0 = arith.constant 0 : i32
    return %arg0, %c0_i32 : i32, i32
  }
  func.func @transform_2(%arg0: i32) -> (i32, i32) {
    %c0_i32 = arith.constant 0 : i32
    %c0_i32_0 = arith.constant 0 : i32
    %c0_i32_1 = arith.constant 0 : i32
    return %c0_i32, %c0_i32_0 : i32, i32
  }
  func.func @transform_3(%arg0: i32) -> (i32, i32) {
    %c0_i32 = arith.constant 0 : i32
    %c0_i32_0 = arith.constant 0 : i32
    %c0_i32_1 = arith.constant 0 : i32
    return %c0_i32, %c0_i32_0 : i32, i32
  }
  func.func @transform_4(%arg0: i32) -> (i32, i32) {
    %c0_i32 = arith.constant 0 : i32
    %c0_i32_0 = arith.constant 0 : i32
    %c0_i32_1 = arith.constant 0 : i32
    return %c0_i32, %c0_i32_0 : i32, i32
  }
  func.func @transform_5(%arg0: i32) -> (i32, i32) {
    %c0_i32 = arith.constant 0 : i32
    %c0_i32_0 = arith.constant 0 : i32
    %c0_i32_1 = arith.constant 0 : i32
    return %c0_i32, %c0_i32_0 : i32, i32
  }
  func.func @transform_6(%arg0: i32) -> (i32, i32) {
    %c0_i32 = arith.constant 0 : i32
    %c0_i32_0 = arith.constant 0 : i32
    %c0_i32_1 = arith.constant 0 : i32
    return %c0_i32, %c0_i32_0 : i32, i32
  }
  func.func @transform_7(%arg0: i32) -> (i32, i32) {
    %c0_i32 = arith.constant 0 : i32
    %c0_i32_0 = arith.constant 0 : i32
    %c0_i32_1 = arith.constant 0 : i32
    return %c0_i32, %c0_i32_0 : i32, i32
  }
  func.func @transform_8(%arg0: i32) -> (i32, i32) {
    %c0_i32 = arith.constant 0 : i32
    %c0_i32_0 = arith.constant 0 : i32
    %c0_i32_1 = arith.constant 0 : i32
    return %c0_i32, %c0_i32_0 : i32, i32
  }
  func.func @transform_9(%arg0: i32) -> (i32, i32) {
    %c0_i32 = arith.constant 0 : i32
    %c0_i32_0 = arith.constant 0 : i32
    return %arg0, %c0_i32 : i32, i32
  }
  func.func @transform_10(%arg0: i32) -> (i32, i32) {
    %c0_i32 = arith.constant 0 : i32
    %c0_i32_0 = arith.constant 0 : i32
    return %arg0, %c0_i32 : i32, i32
  }
}

</mosaic_0001>

<bundles_post_ra>
// kernel: tpu_custom_call.1
= control target key start
LH: loop header
LB: loop body
LE: loop exit
PB: predicated region body
PF: predicated region fallthrough
CT: control target
= control target key end

     0   :  { %16 = vsyncpa [#allocation3], 0  ;;  %s709_s0 = inlined_call_operand.hbm [shape: bf16[8,32], index: 0, kind: input, shape index: {}]   ;;  %s710_s1 = inlined_call_operand.hbm [shape: f32[8,8], index: 1, kind: input, shape index: {}]   ;;  %s711_s2 = inlined_call_operand.vmem [shape: bf16[32,64], index: 2, kind: input, shape index: {}]   ;;  %s712_s3 = inlined_call_operand.vmem [shape: f32[1,64], index: 3, kind: input, shape index: {}]   ;;  %s713_s4 = inlined_call_operand.vmem [shape: bf16[64,64], index: 4, kind: input, shape index: {}]   ;;  %s714_s5 = inlined_call_operand.vmem [shape: f32[1,64], index: 5, kind: input, shape index: {}]   ;;  %s715_s6 = inlined_call_operand.vmem [shape: bf16[64,16], index: 6, kind: input, shape index: {}]   ;;  %s716_s7 = inlined_call_operand.vmem [shape: f32[1,16], index: 7, kind: input, shape index: {}]   ;;  %s717_s8 = inlined_call_operand.vmem [shape: f32[1,8], index: 8, kind: input, shape index: {}]   ;;  %s718_s9 = inlined_call_operand.hbm [shape: f32[8,8], index: 9, kind: output, shape index: {0}]   ;;  %s719_s10 = inlined_call_operand.vmem [shape: f32[8,1], index: 10, kind: output, shape index: {1}]  }
   0x1   :  { %17 = vsyncpa [#allocation6], 0 }
   0x2   :  { %18 = vsyncpa [#allocation4], 0  ;;  %s554_s13 = smov [#allocation2]   ;;  %s555_s15 = smov [#allocation5]  }
   0x3   :  { %s25_s14 = sshll.u32 %s554_s13, 4  ;;  %s35_s16 = sshll.u32 %s555_s15, 4  ;;  %s26_s14 = int_to_ptr.vmem [resolvable:$true] %s25_s14  ;;  %s36_s16 = int_to_ptr.vmem [resolvable:$true] %s35_s16 }
   0x4   :  { %s482_s19 = scalar_lea.hbm %s709_s0, 64 }
   0x5   :  { %p483_p0 = scmp.ne.s32.totalorder %s709_s0, %s482_s19  ;;  %p486_p1 = scmp.lt.u32.totalorder %s482_s19, %s709_s0 }
   0x7   :  { %p488_p2 = pnand %p486_p1, %p483_p0 }
   0x9   :  { %491 = shalt.err (!%p488_p2)
}
   0xa   :  { %s492_s24 = scalar_lea.vmem %s26_s14, 64  ;;  %p497_p4 = scmp.lt.s32.totalorder %s26_s14, %s26_s14 }
   0xb   :  { %p493_p3 = scmp.ne.s32.totalorder %s26_s14, %s492_s24  ;;  %p498_p5 = scmp.lt.s32.totalorder %s492_s24, %s492_s24 }
   0xd   :  { %p499_p6 = por %p498_p5, %p497_p4 }
   0xf   :  { %p500_p7 = pnand %p499_p6, %p493_p3 }
  0x11   :  { %503 = shalt.err (!%p500_p7)
}
  0x12   :  { %28 = dma.hbm_to_vmem [thread:$0]  %s709_s0, 64, %s26_s14, [#allocation3]  }
  0x13   :  { %s504_s29 = scalar_lea.hbm %s710_s1, 128 }
  0x14   :  { %p505_p8 = scmp.ne.s32.totalorder %s710_s1, %s504_s29  ;;  %p508_p9 = scmp.lt.u32.totalorder %s504_s29, %s710_s1 }
  0x16   :  { %p510_p10 = pnand %p508_p9, %p505_p8 }
  0x18   :  { %513 = shalt.err (!%p510_p10)
}
  0x19   :  { %s514_s15 = scalar_lea.vmem %s36_s16, 128  ;;  %p519_p12 = scmp.lt.s32.totalorder %s36_s16, %s36_s16 }
  0x1a   :  { %p515_p11 = scmp.ne.s32.totalorder %s36_s16, %s514_s15  ;;  %p520_p13 = scmp.lt.s32.totalorder %s514_s15, %s514_s15 }
  0x1c   :  { %p521_p0 = por %p520_p13, %p519_p12 }
  0x1e   :  { %p522_p1 = pnand %p521_p0, %p515_p11 }
  0x20   :  { %525 = shalt.err (!%p522_p1)
}
  0x21   :  { %38 = dma.hbm_to_vmem [thread:$0]  %s710_s1, 128, %s36_s16, [#allocation6]  }
  0x22   :  { %548 = dma.done.wait [#allocation3], 64  }
  0x23   :  { %549 = vsyncadd [#allocation3], 4294967232 }
  0x24   :  { %550 = dma.done.wait [#allocation6], 128  }
  0x25   :  { %551 = vsyncadd [#allocation6], 4294967168  ;;  %v556_v0 = vmov 0.0   ;;  %vm557_vm0 = vmmov 0   ;;  %v460_v1 = vld [vmem:[%s711_s2] sm:$0xff]   ;;  %v461_v2 = vld [vmem:[%s711_s2 + $0x8] sm:$0xff]  }
  0x26   :  { %421 = vmatprep.subr.bf16.mxu0 %v556_v0  ;;  %425 = vmatprep.mubr.msk.bf16.mxu0 %vm557_vm0, %v556_v0  ;;  %v462_v3 = vld [vmem:[%s713_s4] sm:$0xff]   ;;  %vm84_vm1 = vcmask 261120   ;;  %v463_v5 = vld [vmem:[%s713_s4 + $0x8] sm:$0xff]   ;;  %v464_v6 = vld [vmem:[%s713_s4 + $0x10] sm:$0xff]   ;;  %vm169_vm2 = vcmask 523264   ;;  %vm354_vm4 = vcmask 64512  }
  0x27   :  { %429 = vmatprep.subr.bf16.mxu1 %v556_v0  ;;  %437 = vmatprep.mubr.msk.bf16.mxu1 %vm557_vm0, %v556_v0  ;;  %v60_v4 = vld [vmem:[#allocation2] sm:$0xf]  ;;  %v465_v7 = vld [vmem:[%s713_s4 + $0x18] sm:$0xff]   ;;  %v467_v9 = vld [vmem:[%s715_s6 + $0x8] sm:$0xff]  }
  0x28   :  { %422 = vmatpush3.bf16.msra.mxu0 %v460_v1  ;;  %430 = vmatpush3.bf16.msra.mxu1 %v462_v3  ;;  %v466_v8 = vld [vmem:[%s715_s6] sm:$0xff]   ;;  %v468_v18 = vld [vmem:[%s715_s6 + $0x10] sm:$0xff]   ;;  %v469_v19 = vld [vmem:[%s715_s6 + $0x18] sm:$0xff]  }
  0x29   :  { %423 = vmatprep.subr.bf16.mxu0 %v556_v0  ;;  %431 = vmatprep.subr.bf16.mxu1 %v556_v0  ;;  %v390_v10 = vld [vmem:[%s712_s3] ss:$0 sm:$0xff]  ;;  %v677_v20 = vld [vmem:[#allocation5] sm:$0xff]  ;;  %s558_s3 = smov 8  }
  0x2a   :  { %315 = vrot.lane.b32.xlu0 %v677_v20, %s558_s3  ;;  %v394_v21 = vld [vmem:[%s714_s5] ss:$0 sm:$0xff]  ;;  %s559_s5 = smov 120  }
  0x2b   :  { %v400_v29 = vld [vmem:[%s716_s7] ss:$0 sm:$0xff] }
  0x2c   :  { %424 = vmatpush3.bf16.msra.mxu0 %v461_v2  ;;  %432 = vmatpush3.bf16.msra.mxu1 %v463_v5  ;;  %v407_v60 = vld [vmem:[%s717_s8] ss:$0 sm:$0xff]  ;;  %v324_v2 = vmul.f32 -0.5, %v677_v20  ;;  %s560_s8 = smov [#allocation7]  }
  0x2d   :  { %441 = vmatprep.subr.bf16.mxu0 %v556_v0  ;;  %433 = vmatprep.subr.bf16.mxu1 %v556_v0  ;;  %s376_s19 = sshll.u32 %s560_s8, 4  ;;  %s377_s19 = int_to_ptr.vmem [resolvable:$true] %s376_s19 }
  0x2e   :  { %s526_s20 = scalar_lea.vmem %s377_s19, 128  ;;  %p531_p3 = scmp.lt.s32.totalorder %s377_s19, %s377_s19 }
  0x2f   :  { %426 = vmatmul.mubr.msk.bf16.vlgmr.msra.gmra.mrb[0].mxu0 %vm84_vm1, %v60_v4  ;;  %p527_p2 = scmp.ne.s32.totalorder %s377_s19, %s526_s20  ;;  %p532_p4 = scmp.lt.s32.totalorder %s526_s20, %s526_s20 }
  0x30   :  { %449 = vmatprep.mubr.msk.bf16.mxu0 %vm557_vm0, %v556_v0  ;;  %434 = vmatpush3.bf16.msra.mxu1 %v464_v6  ;;  %v325_v6 = vmul.f32 %v324_v2, %v677_v20 }
  0x31   :  { %435 = vmatprep.subr.bf16.mxu1 %v556_v0  ;;  %442 = vmatpush3.bf16.msra.mxu0 %v466_v8  ;;  %p533_p5 = por %p532_p4, %p531_p3 }
  0x32   :  { %443 = vmatprep.subr.bf16.mxu0 %v556_v0 }
  0x33   :  { %p534_p6 = pnand %p533_p5, %p527_p2 }
  0x34   :  { %436 = vmatpush3.bf16.msra.mxu1 %v465_v7 }
  0x35   :  { %444 = vmatpush3.bf16.msra.mxu0 %v467_v9 }
  0x36   :  { %445 = vmatprep.subr.bf16.mxu0 %v556_v0 }
  0x39   :  { %446 = vmatpush3.bf16.msra.mxu0 %v468_v18 }
  0x3a   :  { %447 = vmatprep.subr.bf16.mxu0 %v556_v0 }
  0x3d   :  { %448 = vmatpush3.bf16.msra.mxu0 %v469_v19 }
  0x9c   :  { %v316_v49 = vpop.permute.xlu0 %315 }
 0x102   :  { %v122_v11 = vpop.f32.mrb[0].mxu0 }
 0x103   :  { %v123_v12 = vadd.f32 %v390_v10, %v122_v11  ;;  %v427_v13 = vpop.f32.mrb[1].mxu0 }
 0x104   :  { %v125_v14 = vpop.f32.mrb[2].mxu0 }
 0x105   :  { %v128_v15 = vmax.f32 %v123_v12, 0.0  ;;  %v428_v16 = vpop.f32.mrb[3].mxu0 }
 0x107   :  { %v129_v17 = vpack.c.bf16 %v128_v15, %v128_v15 }
 0x109   :  { %438 = vmatmul.mubr.msk.bf16.vlgmr.msra.gmra.mrb[0].mxu1 %vm169_vm2, %v129_v17 }
 0x1dc   :  { %v207_v22 = vpop.f32.mrb[0].mxu1 }
 0x1dd   :  { %v208_v23 = vadd.f32 %v394_v21, %v207_v22  ;;  %v439_v24 = vpop.f32.mrb[1].mxu1 }
 0x1de   :  { %v210_v25 = vpop.f32.mrb[2].mxu1 }
 0x1df   :  { %v213_v26 = vmax.f32 %v208_v23, 0.0  ;;  %v440_v27 = vpop.f32.mrb[3].mxu1 }
 0x1e1   :  { %v214_v28 = vpack.c.bf16 %v213_v26, %v213_v26 }
 0x1e3   :  { %450 = vmatmul.mubr.msk.bf16.vlgmr.msra.gmra.mrb[4].mxu0 %vm169_vm2, %v214_v28 }
 0x2b6   :  { %v291_v30 = vpop.f32.mrb[4].mxu0 }
 0x2b7   :  { %v292_v31 = vadd.f32 %v400_v29, %v291_v30  ;;  %v451_v32 = vpop.f32.mrb[5].mxu0 }
 0x2b8   :  { %v294_v33 = vpop.f32.mrb[6].mxu0 }
 0x2b9   :  { %v298_v34 = vand.u32 2147483647, %v292_v31  ;;  %v452_v35 = vpop.f32.mrb[7].mxu0  ;;  %v297_v46 = vmax.f32 %v292_v31, 0.0 }
 0x2bb   :  { %v299_v36 = vsub.f32 0.0, %v298_v34 }
 0x2bd   :  { %v300_v37 = vmul.f32 1.442695, %v299_v36 }
 0x2bf   :  { %470 = vpow2.f32 %v300_v37 }
 0x2c9   :  { %v471_v38 = vpop.eup %470 }
 0x2ca   :  { %v302_v39 = vadd.f32 1.0, %v471_v38  ;;  %v305_v40 = vmul.f32 -0.5, %v471_v38  ;;  %v308_v42 = vand.u32 2147483647, %v471_v38 }
 0x2cc   :  { %472 = vlog2.f32 %v302_v39  ;;  %v306_v41 = vadd.f32 1.0, %v305_v40  ;;  %vm309_vm3 = vcmp.lt.f32.partialorder %v308_v42, 0.0004427343 }
 0x2ce   :  { %v307_v45 = vmul.f32 %v471_v38, %v306_v41 }
 0x2d6   :  { %v473_v43 = vpop.eup %472 }
 0x2d7   :  { %v304_v44 = vmul.f32 0.6931472, %v473_v43 }
 0x2d9   :  { %v310_v47 = vsel %vm309_vm3, %v307_v45, %v304_v44 }
 0x2da   :  { %v311_v48 = vadd.f32 %v310_v47, %v297_v46 }
 0x2dc   :  { %v312_v50 = vadd.f32 0.001, %v311_v48 }
 0x2de   :  { %v318_v51 = vmul.f32 %v316_v49, %v312_v50  ;;  %474 = vlog2.f32 %v312_v50 }
 0x2e0   :  { %320 = vrot.lane.b32.xlu0 %v318_v51, %s559_s5 }
 0x2e8   :  { %v475_v52 = vpop.eup %474 }
 0x2e9   :  { %v327_v53 = vmul.f32 0.6931472, %v475_v52 }
 0x2eb   :  { %329 = vrot.lane.b32.xlu1 %v327_v53, %s559_s5 }
 0x352   :  { %v321_v54 = vpop.permute.xlu0 %320 }
 0x353   :  { %v323_v55 = vadd.f32 %v321_v54, %v292_v31 }
 0x355   :  { %v335_v56 = vmul.f32 -2.0, %v323_v55  ;;  %476 = vtanh.f32 %v323_v55  ;;  %v334_v12 = vsub.f32 0.6931472, %v323_v55 }
 0x357   :  { %v337_v57 = vand.u32 2147483647, %v335_v56  ;;  %v336_v10 = vmax.f32 %v335_v56, 0.0 }
 0x359   :  { %v338_v58 = vsub.f32 0.0, %v337_v57 }
 0x35b   :  { %v339_v59 = vmul.f32 1.442695, %v338_v58 }
 0x35d   :  { %478 = vpow2.f32 %v339_v59  ;;  %v330_v7 = vpop.permute.xlu1 %329 }
 0x35e   :  { %v332_v13 = vsub.f32 %v325_v6, %v330_v7 }
 0x35f   :  { %v477_v61 = vpop.eup %476 }
 0x360   :  { %v368_v62 = vmul.f32 %v477_v61, %v407_v60  ;;  %v406_v16 = vadd.f32 -0.9189385, %v332_v13 }
 0x362   :  { %369 = vst.msk [vmem:[#allocation7] sm:$0xff] %vm354_vm4, %v368_v62 }
 0x367   :  { %v479_v63 = vpop.eup %478 }
 0x368   :  { %v341_v0 = vadd.f32 1.0, %v479_v63  ;;  %v344_v1 = vmul.f32 -0.5, %v479_v63  ;;  %v347_v4 = vand.u32 2147483647, %v479_v63 }
 0x36a   :  { %480 = vlog2.f32 %v341_v0  ;;  %v345_v3 = vadd.f32 1.0, %v344_v1  ;;  %vm348_vm5 = vcmp.lt.f32.partialorder %v347_v4, 0.0004427343 }
 0x36c   :  { %v346_v9 = vmul.f32 %v479_v63, %v345_v3 }
 0x374   :  { %v481_v5 = vpop.eup %480 }
 0x375   :  { %v343_v8 = vmul.f32 0.6931472, %v481_v5 }
 0x377   :  { %v349_v11 = vsel %vm348_vm5, %v346_v9, %v343_v8 }
 0x378   :  { %v350_v14 = vadd.f32 %v349_v11, %v336_v10 }
 0x37a   :  { %v351_v15 = vsub.f32 %v334_v12, %v350_v14 }
 0x37c   :  { %v352_v17 = vmul.f32 2.0, %v351_v15 }
 0x37e   :  { %v353_v18 = vsub.f32 %v406_v16, %v352_v17 }
 0x380   :  { %v355_v19 = vsel %vm354_vm4, %v353_v18, 0.0 }
 0x381   :  { %356 = vadd.xlane.f32.xlu1 %v355_v19 }
 0x382   :  { %537 = shalt.err (!%p534_p6)
}
 0x383   :  { %s538_s21 = scalar_lea.hbm %s718_s9, 128 }
 0x384   :  { %p539_p7 = scmp.ne.s32.totalorder %s718_s9, %s538_s21  ;;  %p542_p8 = scmp.lt.u32.totalorder %s538_s21, %s718_s9 }
 0x386   :  { %p544_p9 = pnand %p542_p8, %p539_p7 }
 0x388   :  { %547 = shalt.err (!%p544_p9)
}
 0x389   :  { %379 = dma.vmem_to_hbm [thread:$0]  %s377_s19, 128, %s718_s9, [#allocation4]   ;;  %vm358_vm6 = vcmask 7168  }
 0x40e   :  { %v357_v20 = vpop.xlane.xlu1 %356 }
 0x40f   :  { %359 = vst.msk [vmem:[%s719_s10] sm:$0xff] %vm358_vm6, %v357_v20 }
 0x410   :  { %552 = dma.done.wait [#allocation4], 128  }
 0x411   :  { %553 = vsyncadd [#allocation4], 4294967168 }
 0x412   :  { %387 = vsyncpa [#allocation3], 1 }
 0x413   :  { %388 = vsyncpa [#allocation6], 1 }
 0x414   :  { %389 = vsyncpa [#allocation4], 1 }

</bundles_post_ra>
